<compile_context>
chip_gen: v5e
topology: v5e:2x2
jax: 0.10.0
libtpu: 0.0.40
codegen_flags: <defaults>
</compile_context>

<pallas_src>
import functools

import numpy as np
import jax
import jax.numpy as jnp
from jax.experimental import pallas as pl
from jax.experimental.pallas import tpu as pltpu

# Hyperparameters (match the PyTorch module / globals)
VOCAB_SIZE = 130
EMBED_SIZE = 64
NUM_HIDDENS = 64
NUM_LAYERS = 2
ATT_LENGTH = 20
V_PAD = 256        # vocab padded to a lane-dense multiple of 128 for the decoder output
MAX_TILE = 1024    # row-tile cap: HBM-roofline sweet spot, a few MiB VMEM on v5e/v6e/v7x


def _round_up(x, m):
    return ((x + m - 1) // m) * m


# ----------------------------------------------------------------------------
# Kernel A (one shot): LSTM step + .view() table build + W_h/W_c projection + decoder fold.
# Output T (2*TBP, V_PAD):
#   rows [0:TBP)      : T_top[j] = (W_h(h_row_j) + b_h) / A @ Dw_att        (window term)
#   rows [TBP:2*TBP)  : T_bot[j] = (W_c(c_row_j) + b_c) @ Dw_att + o_row_j @ Dw_out
# so that per flattened kept row:  logits = counts @ T_top + one_hot @ T_bot + dec_b.
def prologue_kernel(x_ref, w0_ref, b0_ref, w1_ref, b1_ref,
                    se_ref, so_ref,
                    wh1_ref, wh2_ref, whb_ref,
                    wc1_ref, wc2_ref, wcb_ref,
                    dwa_ref, dwo_ref,
                    t_ref, hb_ref, cb_ref, ob_ref):
    H = NUM_HIDDENS
    nb = x_ref.shape[0]          # 2 * batch  (step-0 rows then step-1 rows)
    tbp = ob_ref.shape[0]        # round_up(2 * batch, 8)
    inv_a = jnp.float32(1.0 / ATT_LENGTH)

    def cell(x, w_ref, b_ref):
        # zero initial state: recurrent term and forget gate are exactly dead (i, g, o only)
        g = jnp.dot(x, w_ref[...], preferred_element_type=jnp.float32) + b_ref[...]
        i = jax.nn.sigmoid(g[:, 0:H])
        gg = jnp.tanh(g[:, H:2 * H])
        o = jax.nn.sigmoid(g[:, 2 * H:3 * H])
        c = i * gg
        return o * jnp.tanh(c), c

    h0, c0 = cell(x_ref[...], w0_ref, b0_ref)
    h1, c1 = cell(h0, w1_ref, b1_ref)        # inter-layer dropout: eval-mode identity

    # Basis tables [layer-0 rows; layer-1 rows] used by the pairing selection matmuls.
    hb_ref[...] = jnp.zeros_like(hb_ref)
    cb_ref[...] = jnp.zeros_like(cb_ref)
    ob_ref[...] = jnp.zeros_like(ob_ref)
    hb_ref[0:nb, :] = h0
    hb_ref[nb:2 * nb, :] = h1
    cb_ref[0:nb, :] = c0
    cb_ref[nb:2 * nb, :] = c1
    ob_ref[0:nb, :] = h1                     # "outputs" table == layer-1 hidden states

    se = se_ref[...]
    so = so_ref[...]
    hb = hb_ref[...]
    cb = cb_ref[...]
    # wh_tab[j] = W_h([chunk(2j) || chunk(2j+1)]) + b_h  via left/right weight halves.
    wh_tab = (jnp.dot(jnp.dot(se, hb, preferred_element_type=jnp.float32),
                      wh1_ref[...], preferred_element_type=jnp.float32)
              + jnp.dot(jnp.dot(so, hb, preferred_element_type=jnp.float32),
                        wh2_ref[...], preferred_element_type=jnp.float32)
              + whb_ref[...])
    wc_tab = (jnp.dot(jnp.dot(se, cb, preferred_element_type=jnp.float32),
                      wc1_ref[...], preferred_element_type=jnp.float32)
              + jnp.dot(jnp.dot(so, cb, preferred_element_type=jnp.float32),
                        wc2_ref[...], preferred_element_type=jnp.float32)
              + wcb_ref[...])
    # Fold the uniform attention weights (1/A) and the decoder weight into the table.
    t_ref[0:tbp, :] = jnp.dot(wh_tab * inv_a, dwa_ref[...],
                              preferred_element_type=jnp.float32)
    t_ref[tbp:2 * tbp, :] = (jnp.dot(wc_tab, dwa_ref[...],
                                     preferred_element_type=jnp.float32)
                             + jnp.dot(ob_ref[...], dwo_ref[...],
                                       preferred_element_type=jnp.float32))


def _prologue(x, prep, se, so, batch):
    H = NUM_HIDDENS
    nb = 2 * batch
    tbp = _round_up(nb, 8)
    p4b = _round_up(2 * nb, 8)
    vmem = pl.BlockSpec(memory_space=pltpu.MemorySpace.VMEM)
    return pl.pallas_call(
        prologue_kernel,
        out_shape=jax.ShapeDtypeStruct((2 * tbp, V_PAD), jnp.float32),
        in_specs=[vmem] * 15,
        out_specs=vmem,
        scratch_shapes=[pltpu.VMEM((p4b, H), jnp.float32),   # h basis
                        pltpu.VMEM((p4b, H), jnp.float32),   # c basis
                        pltpu.VMEM((tbp, H), jnp.float32)],  # lstm-output table
    )(x, prep["w0T"], prep["b0"], prep["w1T"], prep["b1"], se, so,
      prep["wh1"], prep["wh2"], prep["whb"],
      prep["wc1"], prep["wc2"], prep["wcb"],
      prep["dwa"], prep["dwo"])


# ----------------------------------------------------------------------------
# Kernel B (row-tiled, "parallel"): logits = L @ T + dec_bias.  L is the only per-tile
# HBM stream (bf16); T / bias use constant index maps and stay resident across the grid.
def decode_kernel(lhs_ref, t_ref, db_ref, out_ref):
    lhs = lhs_ref[...].astype(jnp.float32)   # bf16 counts / one-hots are exact -> f32
    out_ref[...] = (jnp.dot(lhs, t_ref[...], preferred_element_type=jnp.float32)
                    + db_ref[...])


def _decode(lhs, t_tab, db, tile):
    rows_pad, k2 = lhs.shape
    return pl.pallas_call(
        decode_kernel,
        out_shape=jax.ShapeDtypeStruct((rows_pad, V_PAD), jnp.float32),
        grid=(rows_pad // tile,),
        in_specs=[
            pl.BlockSpec((tile, k2), lambda i: (i, 0)),    # streamed bf16 selection matrix
            pl.BlockSpec((k2, V_PAD), lambda i: (0, 0)),   # grid-invariant folded table
            pl.BlockSpec((1, V_PAD), lambda i: (0, 0)),    # decoder bias (padded lanes = 0)
        ],
        out_specs=pl.BlockSpec((tile, V_PAD), lambda i: (i, 0)),
        compiler_params=pltpu.CompilerParams(dimension_semantics=("parallel",)),
    )(lhs, t_tab, db)


# ----------------------------------------------------------------------------
# Host-side (shape-only) bookkeeping, cached per configuration.
@functools.lru_cache(maxsize=None)
def _selection_mats(batch):
    """Selection matrices pairing raw LSTM rows into the torch .view() 2H table rows.

    Basis rows: [h_l0 (2*batch rows: step0 batches, then step1 batches); h_l1 (same order)].
    Distinct-table row j = [chunk(2j) || chunk(2j+1)] of the row-major stack
    [h_l0[:B]; h_l1[:B]; h_l0[B:]; h_l1[B:]] - exactly the first 2*batch rows of the view.
    """
    nb = 2 * batch
    tbp = _round_up(nb, 8)
    p4b = _round_up(2 * nb, 8)
    se = np.zeros((tbp, p4b), np.float32)
    so = np.zeros((tbp, p4b), np.float32)
    for j in range(nb):
        for mat, p in ((se, 2 * j), (so, 2 * j + 1)):
            s, b = divmod(p, batch)
            basis = (b, nb + b, batch + b, nb + batch + b)[s]
            mat[j, basis] = 1.0
    return jnp.asarray(se), jnp.asarray(so)


def _pick_tile(rows):
    rows16 = _round_up(max(rows, 1), 16)     # 16-row multiples keep bf16 sublane tiling happy
    if rows16 <= 32:
        return rows16                        # single small tile (grid overhead would dominate)
    # >=2 grid steps so ("parallel",) can shard across v7x's two TensorCores; cap at 1024
    # rows: per-step VMEM (L bf16 + f32 logits, double-buffered, plus resident T) stays a
    # few MiB on every generation, and 512-1024-row tiles sit at the HBM-roofline sweet spot.
    return min(MAX_TILE, _round_up(pl.cdiv(rows, 2), 16))


@functools.lru_cache(maxsize=None)
def _build_lhs(batch, steps, lengths, tile):
    """bf16 [window-counts | current-row one-hot] matrix, only for rows kept by
    flatten_padded_sequences (batch-major, first lengths[b]-1 steps of each batch)."""
    A = ATT_LENGTH
    TB = 2 * batch
    tbp = _round_up(TB, 8)
    lens = np.asarray(lengths, np.int64)
    rows = int(np.sum(lens - 1))
    rows_pad = _round_up(max(rows, 1), tile)

    n_idx = np.concatenate([b * steps + np.arange(int(l) - 1)
                            for b, l in enumerate(lens)]).astype(np.int64)
    s_idx = n_idx % steps

    # torch .view() row -> distinct-table row.
    # TODO(synk): this mapping (and the table pairing) assumes batch is even or 1, matching
    # the reference's degenerate row-major .view(); odd batch>1 would straddle table rows.
    def rid(n):
        return np.where(n < TB, n, batch + n % batch)

    lhs = np.zeros((rows_pad, 2 * tbp), np.float32)
    r_idx = np.arange(rows)
    lhs[r_idx, tbp + rid(n_idx)] = 1.0                       # current row (Wc + lstm output)
    for k in range(1, min(A, steps - 1) + 1):                # attention-window counts (Wh)
        m = s_idx >= k
        np.add.at(lhs, (r_idx[m], rid(n_idx[m] - k)), 1.0)
    return jnp.asarray(lhs, dtype=jnp.bfloat16)              # small ints: exact in bf16


# ----------------------------------------------------------------------------
# One-time static weight preparation (cached outside the per-call path).
def prepare_params(params):
    H, V = NUM_HIDDENS, VOCAB_SIZE

    def igo(w, b_sum):   # drop the dead forget gate, keep (i, g, o) contiguous
        w3 = jnp.concatenate([w[0:H], w[2 * H:3 * H], w[3 * H:4 * H]], axis=0)
        b3 = jnp.concatenate([b_sum[0:H], b_sum[2 * H:3 * H], b_sum[3 * H:4 * H]])
        return w3.T, b3.reshape(1, 3 * H)

    w0T, b0 = igo(params["w_ih_l0"], params["b_ih_l0"] + params["b_hh_l0"])
    w1T, b1 = igo(params["w_ih_l1"], params["b_ih_l1"] + params["b_hh_l1"])

    whT = params["W_h_w"].T            # (2H, H)
    wcT = params["W_c_w"].T            # (2H, H)
    dwT = params["dec_w"].T            # (2H, V)
    dwa = jnp.zeros((H, V_PAD), jnp.float32).at[:, :V].set(dwT[:H])
    dwo = jnp.zeros((H, V_PAD), jnp.float32).at[:, :V].set(dwT[H:])
    db = jnp.zeros((1, V_PAD), jnp.float32).at[:, :V].set(params["dec_b"])

    return {
        "embedding": params["embedding"],
        "w0T": w0T, "b0": b0, "w1T": w1T, "b1": b1,
        "wh1": whT[:H], "wh2": whT[H:], "whb": params["W_h_b"].reshape(1, H),
        "wc1": wcT[:H], "wc2": wcT[H:], "wcb": params["W_c_b"].reshape(1, H),
        "dwa": dwa, "dwo": dwo, "db": db,
    }


# ----------------------------------------------------------------------------
# Forward wrapper.
def melody_rnn_forward(prep, inputs, lengths):
    lengths = np.asarray(lengths)
    batch = int(inputs.shape[0])
    steps = int(np.max(lengths))

    # TODO(synk): the embedding row gather (only timesteps 0/1 are ever consumed by the
    # reference loop) and the final kept-row / vocab slice stay in XLA (tiny data-dependent).
    emb = jnp.take(prep["embedding"], inputs[:, :2].T, axis=0)        # (2, batch, E)
    x = emb.reshape(2 * batch, EMBED_SIZE)                            # [t0 rows; t1 rows]

    se, so = _selection_mats(batch)
    t_tab = _prologue(x, prep, se, so, batch)                         # (2*TBP, V_PAD)

    rows = int(np.sum(lengths - 1))
    tile = _pick_tile(rows)
    lhs = _build_lhs(batch, steps, tuple(int(v) for v in lengths), tile)

    logits = _decode(lhs, t_tab, prep["db"], tile)                    # (rows_pad, V_PAD)
    res = logits[:rows, :VOCAB_SIZE]     # flatten_padded_sequences order is built into lhs
    return res, None                     # (res, self.state)


def init_params(key):
    H, E, V = NUM_HIDDENS, EMBED_SIZE, VOCAB_SIZE
    keys = jax.random.split(key, 16)

    def u(k, shape, bound):
        return jax.random.uniform(k, shape, jnp.float32, -bound, bound)

    k_lstm = 1.0 / np.sqrt(H)
    k_lin = 1.0 / np.sqrt(2 * H)
    return {
        "embedding": jax.random.normal(keys[0], (V, E), jnp.float32),
        "w_ih_l0": u(keys[1], (4 * H, E), k_lstm),
        "b_ih_l0": u(keys[2], (4 * H,), k_lstm),
        "b_hh_l0": u(keys[3], (4 * H,), k_lstm),
        "w_ih_l1": u(keys[4], (4 * H, H), k_lstm),
        "b_ih_l1": u(keys[5], (4 * H,), k_lstm),
        "b_hh_l1": u(keys[6], (4 * H,), k_lstm),
        # W_hh_l{0,1} multiply the (zero) initial state only -> no effect, omitted.
        "W_h_w": u(keys[7], (H, 2 * H), k_lin),
        "W_h_b": u(keys[8], (H,), k_lin),
        "W_c_w": u(keys[9], (H, 2 * H), k_lin),
        "W_c_b": u(keys[10], (H,), k_lin),
        "dec_w": u(keys[11], (V, 2 * H), k_lin),
        "dec_b": u(keys[12], (V,), k_lin),
        # self.v (Linear(H,1)) is dead code (mask covers the whole window) -> omitted.
    }


if __name__ == "__main__":
    key = jax.random.PRNGKey(0)
    pkey, ikey = jax.random.split(key)
    params = init_params(pkey)
    prep = prepare_params(params)        # static weight prep: done once, reused per call

    batch, seq = 2, 8
    lengths = np.array([8, 6], dtype=np.int32)          # steps = max(lengths) = 8
    inputs = jax.random.randint(ikey, (batch, seq), 0, VOCAB_SIZE, dtype=jnp.int32)

    res, _state = melody_rnn_forward(prep, inputs, lengths)
    res = jax.block_until_ready(res)
    assert res.shape == (int(np.sum(lengths - 1)), VOCAB_SIZE)
    assert res.dtype == jnp.float32
    print("KERNEL_OK")
</pallas_src>

<mosaic_0001>
module attributes {stable_mosaic.version = 11 : i64} {
  func.func @prologue_kernel(%arg0: memref<4x64xf32, #tpu.memory_space<vmem>>, %arg1: memref<64x192xf32, #tpu.memory_space<vmem>>, %arg2: memref<1x192xf32, #tpu.memory_space<vmem>>, %arg3: memref<64x192xf32, #tpu.memory_space<vmem>>, %arg4: memref<1x192xf32, #tpu.memory_space<vmem>>, %arg5: memref<8x8xf32, #tpu.memory_space<vmem>>, %arg6: memref<8x8xf32, #tpu.memory_space<vmem>>, %arg7: memref<64x64xf32, #tpu.memory_space<vmem>>, %arg8: memref<64x64xf32, #tpu.memory_space<vmem>>, %arg9: memref<1x64xf32, #tpu.memory_space<vmem>>, %arg10: memref<64x64xf32, #tpu.memory_space<vmem>>, %arg11: memref<64x64xf32, #tpu.memory_space<vmem>>, %arg12: memref<1x64xf32, #tpu.memory_space<vmem>>, %arg13: memref<64x256xf32, #tpu.memory_space<vmem>>, %arg14: memref<64x256xf32, #tpu.memory_space<vmem>>, %arg15: memref<16x256xf32, #tpu.memory_space<vmem>>, %arg16: memref<8x64xf32, #tpu.memory_space<vmem>>, %arg17: memref<8x64xf32, #tpu.memory_space<vmem>>, %arg18: memref<8x64xf32, #tpu.memory_space<vmem>>) attributes {dimension_semantics = [], scalar_prefetch = 0 : i64, scratch_operands = 3 : i64, tpu.core_type = #tpu.core_type<tc>} {
    %c0 = arith.constant 0 : index
    %c0_0 = arith.constant 0 : index
    %0 = vector.load %arg0[%c0, %c0_0] : memref<4x64xf32, #tpu.memory_space<vmem>>, vector<4x64xf32>
    %c0_1 = arith.constant 0 : index
    %c0_2 = arith.constant 0 : index
    %1 = vector.load %arg1[%c0_1, %c0_2] : memref<64x192xf32, #tpu.memory_space<vmem>>, vector<64x192xf32>
    %cst = arith.constant dense<0.000000e+00> : vector<4x192xf32>
    %2 = tpu.matmul %0, %1, %cst {dimension_numbers = #tpu.dot_dimension_numbers<[1], [0], [0], [1], [0, 0, 1, 1], [], []>} : vector<4x64xf32>, vector<64x192xf32>, vector<4x192xf32> -> vector<4x192xf32>
    %c0_3 = arith.constant 0 : index
    %c0_4 = arith.constant 0 : index
    %3 = vector.load %arg2[%c0_3, %c0_4] : memref<1x192xf32, #tpu.memory_space<vmem>>, vector<1x192xf32>
    %4 = vector.broadcast %3 : vector<1x192xf32> to vector<4x192xf32>
    %5 = arith.addf %2, %4 : vector<4x192xf32>
    %6 = vector.extract_strided_slice %5 {offsets = [0, 0], sizes = [4, 64], strides = [1, 1]} : vector<4x192xf32> to vector<4x64xf32>
    %7 = arith.negf %6 : vector<4x64xf32>
    %8 = math.exp %7 : vector<4x64xf32>
    %cst_5 = arith.constant 1.000000e+00 : f32
    %9 = vector.broadcast %cst_5 : f32 to vector<4x64xf32>
    %10 = arith.addf %9, %8 : vector<4x64xf32>
    %11 = arith.divf %9, %10 : vector<4x64xf32>
    %12 = vector.extract_strided_slice %5 {offsets = [0, 64], sizes = [4, 64], strides = [1, 1]} : vector<4x192xf32> to vector<4x64xf32>
    %13 = math.tanh %12 : vector<4x64xf32>
    %14 = vector.extract_strided_slice %5 {offsets = [0, 128], sizes = [4, 64], strides = [1, 1]} : vector<4x192xf32> to vector<4x64xf32>
    %15 = arith.negf %14 : vector<4x64xf32>
    %16 = math.exp %15 : vector<4x64xf32>
    %cst_6 = arith.constant 1.000000e+00 : f32
    %17 = vector.broadcast %cst_6 : f32 to vector<4x64xf32>
    %18 = arith.addf %17, %16 : vector<4x64xf32>
    %19 = arith.divf %17, %18 : vector<4x64xf32>
    %20 = arith.mulf %11, %13 : vector<4x64xf32>
    %21 = math.tanh %20 : vector<4x64xf32>
    %22 = arith.mulf %19, %21 : vector<4x64xf32>
    %c0_7 = arith.constant 0 : index
    %c0_8 = arith.constant 0 : index
    %23 = vector.load %arg3[%c0_7, %c0_8] : memref<64x192xf32, #tpu.memory_space<vmem>>, vector<64x192xf32>
    %cst_9 = arith.constant dense<0.000000e+00> : vector<4x192xf32>
    %24 = tpu.matmul %22, %23, %cst_9 {dimension_numbers = #tpu.dot_dimension_numbers<[1], [0], [0], [1], [0, 0, 1, 1], [], []>} : vector<4x64xf32>, vector<64x192xf32>, vector<4x192xf32> -> vector<4x192xf32>
    %c0_10 = arith.constant 0 : index
    %c0_11 = arith.constant 0 : index
    %25 = vector.load %arg4[%c0_10, %c0_11] : memref<1x192xf32, #tpu.memory_space<vmem>>, vector<1x192xf32>
    %26 = vector.broadcast %25 : vector<1x192xf32> to vector<4x192xf32>
    %27 = arith.addf %24, %26 : vector<4x192xf32>
    %28 = vector.extract_strided_slice %27 {offsets = [0, 0], sizes = [4, 64], strides = [1, 1]} : vector<4x192xf32> to vector<4x64xf32>
    %29 = arith.negf %28 : vector<4x64xf32>
    %30 = math.exp %29 : vector<4x64xf32>
    %cst_12 = arith.constant 1.000000e+00 : f32
    %31 = vector.broadcast %cst_12 : f32 to vector<4x64xf32>
    %32 = arith.addf %31, %30 : vector<4x64xf32>
    %33 = arith.divf %31, %32 : vector<4x64xf32>
    %34 = vector.extract_strided_slice %27 {offsets = [0, 64], sizes = [4, 64], strides = [1, 1]} : vector<4x192xf32> to vector<4x64xf32>
    %35 = math.tanh %34 : vector<4x64xf32>
    %36 = vector.extract_strided_slice %27 {offsets = [0, 128], sizes = [4, 64], strides = [1, 1]} : vector<4x192xf32> to vector<4x64xf32>
    %37 = arith.negf %36 : vector<4x64xf32>
    %38 = math.exp %37 : vector<4x64xf32>
    %cst_13 = arith.constant 1.000000e+00 : f32
    %39 = vector.broadcast %cst_13 : f32 to vector<4x64xf32>
    %40 = arith.addf %39, %38 : vector<4x64xf32>
    %41 = arith.divf %39, %40 : vector<4x64xf32>
    %42 = arith.mulf %33, %35 : vector<4x64xf32>
    %43 = math.tanh %42 : vector<4x64xf32>
    %44 = arith.mulf %41, %43 : vector<4x64xf32>
    %cst_14 = arith.constant 0.000000e+00 : f32
    %45 = vector.broadcast %cst_14 : f32 to vector<8x64xf32>
    %c0_15 = arith.constant 0 : index
    %c0_16 = arith.constant 0 : index
    %46 = vector.load %arg16[%c0_15, %c0_16] : memref<8x64xf32, #tpu.memory_space<vmem>>, vector<8x64xf32>
    tpu.vector_store %arg16[%c0_15, %c0_16], %45 {strides = array<i32>} : memref<8x64xf32, #tpu.memory_space<vmem>>, vector<8x64xf32>,
    %cst_17 = arith.constant 0.000000e+00 : f32
    %47 = vector.broadcast %cst_17 : f32 to vector<8x64xf32>
    %c0_18 = arith.constant 0 : index
    %c0_19 = arith.constant 0 : index
    %48 = vector.load %arg17[%c0_18, %c0_19] : memref<8x64xf32, #tpu.memory_space<vmem>>, vector<8x64xf32>
    tpu.vector_store %arg17[%c0_18, %c0_19], %47 {strides = array<i32>} : memref<8x64xf32, #tpu.memory_space<vmem>>, vector<8x64xf32>,
    %cst_20 = arith.constant 0.000000e+00 : f32
    %49 = vector.broadcast %cst_20 : f32 to vector<8x64xf32>
    %c0_21 = arith.constant 0 : index
    %c0_22 = arith.constant 0 : index
    %50 = vector.load %arg18[%c0_21, %c0_22] : memref<8x64xf32, #tpu.memory_space<vmem>>, vector<8x64xf32>
    tpu.vector_store %arg18[%c0_21, %c0_22], %49 {strides = array<i32>} : memref<8x64xf32, #tpu.memory_space<vmem>>, vector<8x64xf32>,
    %c0_23 = arith.constant 0 : index
    %c0_24 = arith.constant 0 : index
    %51 = vector.load %arg16[%c0_23, %c0_24] : memref<8x64xf32, #tpu.memory_space<vmem>>, vector<4x64xf32>
    tpu.vector_store %arg16[%c0_23, %c0_24], %22 {strides = array<i32>} : memref<8x64xf32, #tpu.memory_space<vmem>>, vector<4x64xf32>,
    %c4 = arith.constant 4 : index
    %c0_25 = arith.constant 0 : index
    %52 = vector.load %arg16[%c4, %c0_25] : memref<8x64xf32, #tpu.memory_space<vmem>>, vector<4x64xf32>
    tpu.vector_store %arg16[%c4, %c0_25], %44 {strides = array<i32>} : memref<8x64xf32, #tpu.memory_space<vmem>>, vector<4x64xf32>,
    %c0_26 = arith.constant 0 : index
    %c0_27 = arith.constant 0 : index
    %53 = vector.load %arg17[%c0_26, %c0_27] : memref<8x64xf32, #tpu.memory_space<vmem>>, vector<4x64xf32>
    tpu.vector_store %arg17[%c0_26, %c0_27], %20 {strides = array<i32>} : memref<8x64xf32, #tpu.memory_space<vmem>>, vector<4x64xf32>,
    %c4_28 = arith.constant 4 : index
    %c0_29 = arith.constant 0 : index
    %54 = vector.load %arg17[%c4_28, %c0_29] : memref<8x64xf32, #tpu.memory_space<vmem>>, vector<4x64xf32>
    tpu.vector_store %arg17[%c4_28, %c0_29], %42 {strides = array<i32>} : memref<8x64xf32, #tpu.memory_space<vmem>>, vector<4x64xf32>,
    %c0_30 = arith.constant 0 : index
    %c0_31 = arith.constant 0 : index
    %55 = vector.load %arg18[%c0_30, %c0_31] : memref<8x64xf32, #tpu.memory_space<vmem>>, vector<4x64xf32>
    tpu.vector_store %arg18[%c0_30, %c0_31], %44 {strides = array<i32>} : memref<8x64xf32, #tpu.memory_space<vmem>>, vector<4x64xf32>,
    %c0_32 = arith.constant 0 : index
    %c0_33 = arith.constant 0 : index
    %56 = vector.load %arg5[%c0_32, %c0_33] : memref<8x8xf32, #tpu.memory_space<vmem>>, vector<8x8xf32>
    %c0_34 = arith.constant 0 : index
    %c0_35 = arith.constant 0 : index
    %57 = vector.load %arg6[%c0_34, %c0_35] : memref<8x8xf32, #tpu.memory_space<vmem>>, vector<8x8xf32>
    %c0_36 = arith.constant 0 : index
    %c0_37 = arith.constant 0 : index
    %58 = vector.load %arg16[%c0_36, %c0_37] : memref<8x64xf32, #tpu.memory_space<vmem>>, vector<8x64xf32>
    %c0_38 = arith.constant 0 : index
    %c0_39 = arith.constant 0 : index
    %59 = vector.load %arg17[%c0_38, %c0_39] : memref<8x64xf32, #tpu.memory_space<vmem>>, vector<8x64xf32>
    %cst_40 = arith.constant dense<0.000000e+00> : vector<8x64xf32>
    %60 = tpu.matmul %56, %58, %cst_40 {dimension_numbers = #tpu.dot_dimension_numbers<[1], [0], [0], [1], [0, 0, 1, 1], [], []>} : vector<8x8xf32>, vector<8x64xf32>, vector<8x64xf32> -> vector<8x64xf32>
    %c0_41 = arith.constant 0 : index
    %c0_42 = arith.constant 0 : index
    %61 = vector.load %arg7[%c0_41, %c0_42] : memref<64x64xf32, #tpu.memory_space<vmem>>, vector<64x64xf32>
    %cst_43 = arith.constant dense<0.000000e+00> : vector<8x64xf32>
    %62 = tpu.matmul %60, %61, %cst_43 {dimension_numbers = #tpu.dot_dimension_numbers<[1], [0], [0], [1], [0, 0, 1, 1], [], []>} : vector<8x64xf32>, vector<64x64xf32>, vector<8x64xf32> -> vector<8x64xf32>
    %cst_44 = arith.constant dense<0.000000e+00> : vector<8x64xf32>
    %63 = tpu.matmul %57, %58, %cst_44 {dimension_numbers = #tpu.dot_dimension_numbers<[1], [0], [0], [1], [0, 0, 1, 1], [], []>} : vector<8x8xf32>, vector<8x64xf32>, vector<8x64xf32> -> vector<8x64xf32>
    %c0_45 = arith.constant 0 : index
    %c0_46 = arith.constant 0 : index
    %64 = vector.load %arg8[%c0_45, %c0_46] : memref<64x64xf32, #tpu.memory_space<vmem>>, vector<64x64xf32>
    %cst_47 = arith.constant dense<0.000000e+00> : vector<8x64xf32>
    %65 = tpu.matmul %63, %64, %cst_47 {dimension_numbers = #tpu.dot_dimension_numbers<[1], [0], [0], [1], [0, 0, 1, 1], [], []>} : vector<8x64xf32>, vector<64x64xf32>, vector<8x64xf32> -> vector<8x64xf32>
    %66 = arith.addf %62, %65 : vector<8x64xf32>
    %c0_48 = arith.constant 0 : index
    %c0_49 = arith.constant 0 : index
    %67 = vector.load %arg9[%c0_48, %c0_49] : memref<1x64xf32, #tpu.memory_space<vmem>>, vector<1x64xf32>
    %68 = vector.broadcast %67 : vector<1x64xf32> to vector<8x64xf32>
    %69 = arith.addf %66, %68 : vector<8x64xf32>
    %cst_50 = arith.constant dense<0.000000e+00> : vector<8x64xf32>
    %70 = tpu.matmul %56, %59, %cst_50 {dimension_numbers = #tpu.dot_dimension_numbers<[1], [0], [0], [1], [0, 0, 1, 1], [], []>} : vector<8x8xf32>, vector<8x64xf32>, vector<8x64xf32> -> vector<8x64xf32>
    %c0_51 = arith.constant 0 : index
    %c0_52 = arith.constant 0 : index
    %71 = vector.load %arg10[%c0_51, %c0_52] : memref<64x64xf32, #tpu.memory_space<vmem>>, vector<64x64xf32>
    %cst_53 = arith.constant dense<0.000000e+00> : vector<8x64xf32>
    %72 = tpu.matmul %70, %71, %cst_53 {dimension_numbers = #tpu.dot_dimension_numbers<[1], [0], [0], [1], [0, 0, 1, 1], [], []>} : vector<8x64xf32>, vector<64x64xf32>, vector<8x64xf32> -> vector<8x64xf32>
    %cst_54 = arith.constant dense<0.000000e+00> : vector<8x64xf32>
    %73 = tpu.matmul %57, %59, %cst_54 {dimension_numbers = #tpu.dot_dimension_numbers<[1], [0], [0], [1], [0, 0, 1, 1], [], []>} : vector<8x8xf32>, vector<8x64xf32>, vector<8x64xf32> -> vector<8x64xf32>
    %c0_55 = arith.constant 0 : index
    %c0_56 = arith.constant 0 : index
    %74 = vector.load %arg11[%c0_55, %c0_56] : memref<64x64xf32, #tpu.memory_space<vmem>>, vector<64x64xf32>
    %cst_57 = arith.constant dense<0.000000e+00> : vector<8x64xf32>
    %75 = tpu.matmul %73, %74, %cst_57 {dimension_numbers = #tpu.dot_dimension_numbers<[1], [0], [0], [1], [0, 0, 1, 1], [], []>} : vector<8x64xf32>, vector<64x64xf32>, vector<8x64xf32> -> vector<8x64xf32>
    %76 = arith.addf %72, %75 : vector<8x64xf32>
    %c0_58 = arith.constant 0 : index
    %c0_59 = arith.constant 0 : index
    %77 = vector.load %arg12[%c0_58, %c0_59] : memref<1x64xf32, #tpu.memory_space<vmem>>, vector<1x64xf32>
    %78 = vector.broadcast %77 : vector<1x64xf32> to vector<8x64xf32>
    %79 = arith.addf %76, %78 : vector<8x64xf32>
    %cst_60 = arith.constant 5.000000e-02 : f32
    %80 = vector.broadcast %cst_60 : f32 to vector<8x64xf32>
    %81 = arith.mulf %69, %80 : vector<8x64xf32>
    %c0_61 = arith.constant 0 : index
    %c0_62 = arith.constant 0 : index
    %82 = vector.load %arg13[%c0_61, %c0_62] : memref<64x256xf32, #tpu.memory_space<vmem>>, vector<64x256xf32>
    %cst_63 = arith.constant dense<0.000000e+00> : vector<8x256xf32>
    %83 = tpu.matmul %81, %82, %cst_63 {dimension_numbers = #tpu.dot_dimension_numbers<[1], [0], [0], [1], [0, 0, 1, 1], [], []>} : vector<8x64xf32>, vector<64x256xf32>, vector<8x256xf32> -> vector<8x256xf32>
    %c0_64 = arith.constant 0 : index
    %c0_65 = arith.constant 0 : index
    %84 = vector.load %arg15[%c0_64, %c0_65] : memref<16x256xf32, #tpu.memory_space<vmem>>, vector<8x256xf32>
    tpu.vector_store %arg15[%c0_64, %c0_65], %83 {strides = array<i32>} : memref<16x256xf32, #tpu.memory_space<vmem>>, vector<8x256xf32>,
    %c0_66 = arith.constant 0 : index
    %c0_67 = arith.constant 0 : index
    %85 = vector.load %arg13[%c0_66, %c0_67] : memref<64x256xf32, #tpu.memory_space<vmem>>, vector<64x256xf32>
    %cst_68 = arith.constant dense<0.000000e+00> : vector<8x256xf32>
    %86 = tpu.matmul %79, %85, %cst_68 {dimension_numbers = #tpu.dot_dimension_numbers<[1], [0], [0], [1], [0, 0, 1, 1], [], []>} : vector<8x64xf32>, vector<64x256xf32>, vector<8x256xf32> -> vector<8x256xf32>
    %c0_69 = arith.constant 0 : index
    %c0_70 = arith.constant 0 : index
    %87 = vector.load %arg18[%c0_69, %c0_70] : memref<8x64xf32, #tpu.memory_space<vmem>>, vector<8x64xf32>
    %c0_71 = arith.constant 0 : index
    %c0_72 = arith.constant 0 : index
    %88 = vector.load %arg14[%c0_71, %c0_72] : memref<64x256xf32, #tpu.memory_space<vmem>>, vector<64x256xf32>
    %cst_73 = arith.constant dense<0.000000e+00> : vector<8x256xf32>
    %89 = tpu.matmul %87, %88, %cst_73 {dimension_numbers = #tpu.dot_dimension_numbers<[1], [0], [0], [1], [0, 0, 1, 1], [], []>} : vector<8x64xf32>, vector<64x256xf32>, vector<8x256xf32> -> vector<8x256xf32>
    %90 = arith.addf %86, %89 : vector<8x256xf32>
    %c8 = arith.constant 8 : index
    %c0_74 = arith.constant 0 : index
    %91 = vector.load %arg15[%c8, %c0_74] : memref<16x256xf32, #tpu.memory_space<vmem>>, vector<8x256xf32>
    tpu.vector_store %arg15[%c8, %c0_74], %90 {strides = array<i32>} : memref<16x256xf32, #tpu.memory_space<vmem>>, vector<8x256xf32>,
    return
  }
}

</mosaic_0001>

<bundles_post_ra>
// kernel: tpu_custom_call.1
= control target key start
LH: loop header
LB: loop body
LE: loop exit
PB: predicated region body
PF: predicated region fallthrough
CT: control target
= control target key end

     0   :  { %20 = vsyncpa [#allocation6], 0  ;;  %s1493_s0 = inlined_call_operand.hbm [shape: f32[4,64], index: 0, kind: input, shape index: {}]   ;;  %s1494_s1 = inlined_call_operand.hbm [shape: f32[64,192], index: 1, kind: input, shape index: {}]   ;;  %s1495_s2 = inlined_call_operand.hbm [shape: f32[1,192], index: 2, kind: input, shape index: {}]   ;;  %s1496_s3 = inlined_call_operand.hbm [shape: f32[64,192], index: 3, kind: input, shape index: {}]   ;;  %s1497_s4 = inlined_call_operand.vmem [shape: f32[1,192], index: 4, kind: input, shape index: {}]   ;;  %s1498_s5 = inlined_call_operand.hbm [shape: f32[8,8], index: 5, kind: input, shape index: {}]   ;;  %s1499_s6 = inlined_call_operand.hbm [shape: f32[8,8], index: 6, kind: input, shape index: {}]   ;;  %s1500_s7 = inlined_call_operand.hbm [shape: f32[64,64], index: 7, kind: input, shape index: {}]   ;;  %s1501_s8 = inlined_call_operand.hbm [shape: f32[64,64], index: 8, kind: input, shape index: {}]   ;;  %s1502_s9 = inlined_call_operand.vmem [shape: f32[1,64], index: 9, kind: input, shape index: {}]   ;;  %s1503_s10 = inlined_call_operand.hbm [shape: f32[64,64], index: 10, kind: input, shape index: {}]   ;;  %s1504_s11 = inlined_call_operand.hbm [shape: f32[64,64], index: 11, kind: input, shape index: {}]   ;;  %s1505_s12 = inlined_call_operand.vmem [shape: f32[1,64], index: 12, kind: input, shape index: {}]   ;;  %s1506_s13 = inlined_call_operand.hbm [shape: f32[64,256], index: 13, kind: input, shape index: {}]   ;;  %s1507_s14 = inlined_call_operand.hbm [shape: f32[64,256], index: 14, kind: input, shape index: {}]   ;;  %s1508_s15 = inlined_call_operand.hbm [shape: f32[16,256], index: 15, kind: output, shape index: {}]  }
   0x1   :  { %21 = vsyncpa [#allocation9], 0 }
   0x2   :  { %22 = vsyncpa [#allocation12], 0 }
   0x3   :  { %23 = vsyncpa [#allocation15], 0 }
   0x4   :  { %24 = vsyncpa [#allocation18], 0 }
   0x5   :  { %25 = vsyncpa [#allocation21], 0 }
   0x6   :  { %26 = vsyncpa [#allocation24], 0  ;;  %s43_s20 = sshll.u32 %s1494_s1, 4  ;;  %s44_s20 = int_to_ptr.hbm [resolvable:$true] %s43_s20 }
   0x7   :  { %27 = vsyncpa [#allocation7], 0  ;;  %s1291_s21 = smov [#allocation8]   ;;  %s67_s25 = sshll.u32 %s1496_s3, 4  ;;  %s68_s25 = int_to_ptr.hbm [resolvable:$true] %s67_s25 }
   0x8   :  { %s45_s22 = sshll.u32 %s1291_s21, 4  ;;  %s1292_s26 = smov 256   ;;  %s46_s22 = int_to_ptr.vmem [resolvable:$true] %s45_s22 }
   0x9   :  { %s1293_s27 = smov 16   ;;  %s1294_s28 = smov [#allocation11]  }
   0xa   :  { %51 = dma.hbm_to_vmem [thread:$0]  %s44_s20, 2048, %s46_s22, [#allocation9], %s1292_s26, %s1292_s26, %s1293_s27  }
   0xb   :  { %s69_s29 = sshll.u32 %s1294_s28, 4  ;;  %s94_s16 = sshll.u32 %s1499_s6, 4  ;;  %s70_s29 = int_to_ptr.vmem [resolvable:$true] %s69_s29  ;;  %s95_s16 = int_to_ptr.hbm [resolvable:$true] %s94_s16 }
   0xc   :  { %75 = dma.hbm_to_vmem [thread:$0]  %s68_s25, 2048, %s70_s29, [#allocation12], %s1292_s26, %s1292_s26, %s1293_s27  }
   0xd   :  { %s1295_s3 = smov [#allocation14]   ;;  %s117_s20 = sshll.u32 %s1501_s8, 4  ;;  %s118_s20 = int_to_ptr.hbm [resolvable:$true] %s117_s20 }
   0xe   :  { %s96_s17 = sshll.u32 %s1295_s3, 4  ;;  %s1296_s21 = smov [#allocation17]   ;;  %s97_s17 = int_to_ptr.vmem [resolvable:$true] %s96_s17 }
   0xf   :  { %99 = dma.hbm_to_vmem [thread:$0]  %s95_s16, 128, %s97_s17, [#allocation15]  }
  0x10   :  { %s119_s22 = sshll.u32 %s1296_s21, 4  ;;  %s145_s6 = sshll.u32 %s1504_s11, 4  ;;  %s120_s22 = int_to_ptr.vmem [resolvable:$true] %s119_s22  ;;  %s146_s6 = int_to_ptr.hbm [resolvable:$true] %s145_s6 }
  0x11   :  { %s1297_s28 = smov 128   ;;  %s1298_s30 = smov 8  }
  0x12   :  { %125 = dma.hbm_to_vmem [thread:$0]  %s118_s20, 1024, %s120_s22, [#allocation18], %s1297_s28, %s1297_s28, %s1298_s30  }
  0x13   :  { %s33_s8 = sshll.u32 %s1493_s0, 4  ;;  %s1299_s1 = smov [#allocation20]   ;;  %s34_s8 = int_to_ptr.hbm [resolvable:$true] %s33_s8 }
  0x14   :  { %s147_s16 = sshll.u32 %s1299_s1, 4  ;;  %s1300_s11 = smov [#allocation5]   ;;  %s148_s16 = int_to_ptr.vmem [resolvable:$true] %s147_s16 }
  0x15   :  { %153 = dma.hbm_to_vmem [thread:$0]  %s146_s6, 1024, %s148_s16, [#allocation21], %s1297_s28, %s1297_s28, %s1298_s30  }
  0x16   :  { %s35_s3 = sshll.u32 %s1300_s11, 4  ;;  %s57_s19 = sshll.u32 %s1495_s2, 4  ;;  %s36_s3 = int_to_ptr.vmem [resolvable:$true] %s35_s3  ;;  %s58_s19 = int_to_ptr.hbm [resolvable:$true] %s57_s19 }
  0x17   :  { %38 = dma.hbm_to_vmem [thread:$0]  %s34_s8, 64, %s36_s3, [#allocation6]  }
  0x18   :  { %s83_s0 = sshll.u32 %s1498_s5, 4  ;;  %s1301_s22 = smov [#allocation10]   ;;  %s84_s0 = int_to_ptr.hbm [resolvable:$true] %s83_s0 }
  0x19   :  { %s59_s23 = sshll.u32 %s1301_s22, 4  ;;  %s1302_s24 = smov [#allocation13]   ;;  %s60_s23 = int_to_ptr.vmem [resolvable:$true] %s59_s23 }
  0x1a   :  { %62 = dma.hbm_to_vmem [thread:$0]  %s58_s19, 32, %s60_s23, [#allocation9]  }
  0x1b   :  { %s85_s6 = sshll.u32 %s1302_s24, 4  ;;  %s104_s1 = sshll.u32 %s1500_s7, 4  ;;  %s86_s6 = int_to_ptr.vmem [resolvable:$true] %s85_s6  ;;  %s105_s1 = int_to_ptr.hbm [resolvable:$true] %s104_s1 }
  0x1c   :  { %88 = dma.hbm_to_vmem [thread:$0]  %s84_s0, 128, %s86_s6, [#allocation12]  }
  0x1d   :  { %s132_s16 = sshll.u32 %s1503_s10, 4  ;;  %s1303_s11 = smov [#allocation16]   ;;  %s133_s16 = int_to_ptr.hbm [resolvable:$true] %s132_s16 }
  0x1e   :  { %s106_s5 = sshll.u32 %s1303_s11, 4  ;;  %s1304_s3 = smov [#allocation19]   ;;  %s107_s5 = int_to_ptr.vmem [resolvable:$true] %s106_s5 }
  0x1f   :  { %112 = dma.hbm_to_vmem [thread:$0]  %s105_s1, 1024, %s107_s5, [#allocation15], %s1297_s28, %s1297_s28, %s1298_s30  }
  0x20   :  { %s134_s17 = sshll.u32 %s1304_s3, 4  ;;  %s160_s7 = sshll.u32 %s1506_s13, 4  ;;  %s135_s17 = int_to_ptr.vmem [resolvable:$true] %s134_s17  ;;  %s161_s7 = int_to_ptr.hbm [resolvable:$true] %s160_s7 }
  0x21   :  { %140 = dma.hbm_to_vmem [thread:$0]  %s133_s16, 1024, %s135_s17, [#allocation18], %s1297_s28, %s1297_s28, %s1298_s30  }
  0x22   :  { %s173_s21 = sshll.u32 %s1507_s14, 4  ;;  %s1305_s0 = smov [#allocation22]   ;;  %s174_s21 = int_to_ptr.hbm [resolvable:$true] %s173_s21 }
  0x23   :  { %s162_s22 = sshll.u32 %s1305_s0, 4  ;;  %s1306_s23 = smov [#allocation23]   ;;  %s163_s22 = int_to_ptr.vmem [resolvable:$true] %s162_s22 }
  0x24   :  { %168 = dma.hbm_to_vmem [thread:$0]  %s161_s7, 2048, %s163_s22, [#allocation21], %s1292_s26, %s1292_s26, %s1293_s27  }
  0x25   :  { %s175_s13 = sshll.u32 %s1306_s23, 4  ;;  %s176_s13 = int_to_ptr.vmem [resolvable:$true] %s175_s13 }
  0x26   :  { %181 = dma.hbm_to_vmem [thread:$0]  %s174_s21, 2048, %s176_s13, [#allocation24], %s1292_s26, %s1292_s26, %s1293_s27  }
  0x27   :  { %1275 = dma.done.wait [#allocation6], 64  }
  0x28   :  { %1276 = vsyncadd [#allocation6], 4294967232 }
  0x29   :  { %1277 = dma.done.wait [#allocation9], 2080  }
  0x2a   :  { %1278 = vsyncadd [#allocation9], 4294965216 }
  0x2b   :  { %1279 = dma.done.wait [#allocation12], 2176  }
  0x2c   :  { %1280 = vsyncadd [#allocation12], 4294965120 }
  0x2d   :  { %1281 = dma.done.wait [#allocation15], 1152  }
  0x2e   :  { %1282 = vsyncadd [#allocation15], 4294966144 }
  0x2f   :  { %1283 = dma.done.wait [#allocation18], 2048  }
  0x30   :  { %1284 = vsyncadd [#allocation18], 4294965248 }
  0x31   :  { %1285 = dma.done.wait [#allocation21], 3072  }
  0x32   :  { %1286 = vsyncadd [#allocation21], 4294964224 }
  0x33   :  { %1287 = dma.done.wait [#allocation24], 2048  }
  0x34   :  { %1288 = vsyncadd [#allocation24], 4294965248  ;;  %v245_v0 = vld [vmem:[#allocation8 + $0x70] sm:$0xff]  ;;  %v243_v1 = vld [vmem:[#allocation8 + $0x60] sm:$0xff]  ;;  %vm253_vm0 = vcmask 523264   ;;  %v1307_v21 = vmov 0.0  }
  0x35   :  { %265 = vmatpush.msra.mxu0 %v245_v0  ;;  %v241_v2 = vld [vmem:[#allocation8 + $0x50] sm:$0xff]  ;;  %v246_v3 = vld [vmem:[#allocation8 + $0x78] sm:$0xff]  ;;  %v244_v4 = vld [vmem:[#allocation8 + $0x68] sm:$0xff]  ;;  %455 = vst.msk [vmem:[#allocation3] sm:$0xff] %vm253_vm0, %v1307_v21  ;;  %s1308_s14 = smov 64   ;;  %vm457_vm5 = vcmask 519168  }
  0x36   :  { %v239_v5 = vld [vmem:[#allocation8 + $0x40] sm:$0xff]  ;;  %285 = vmatpush.msra.mxu1 %v246_v3  ;;  %v242_v6 = vld [vmem:[#allocation8 + $0x58] sm:$0xff]  ;;  %v237_v7 = vld [vmem:[#allocation8 + $0x30] sm:$0xff]  ;;  %456 = vst.msk [vmem:[#allocation4] sm:$0xff] %vm253_vm0, %v1307_v21 }
  0x37   :  { %266 = vmatpush.msra.mxu0 %v243_v1  ;;  %v240_v8 = vld [vmem:[#allocation8 + $0x48] sm:$0xff]  ;;  %v235_v9 = vld [vmem:[#allocation8 + $0x20] sm:$0xff]  ;;  %v238_v10 = vld [vmem:[#allocation8 + $0x38] sm:$0xff]  ;;  %454 = vst.msk [vmem:[#allocation2] sm:$0xff] %vm253_vm0, %v1307_v21 }
  0x38   :  { %286 = vmatpush.msra.mxu1 %v244_v4  ;;  %v233_v11 = vld [vmem:[#allocation8 + $0x10] sm:$0xff]  ;;  %v236_v12 = vld [vmem:[#allocation8 + $0x28] sm:$0xff]  ;;  %v231_v13 = vld [vmem:[#allocation8] sm:$0xff] }
  0x39   :  { %267 = vmatpush.msra.mxu0 %v241_v2  ;;  %v230_v14 = vld [vmem:[#allocation5] sm:$0xf]  ;;  %v232_v16 = vld [vmem:[#allocation8 + $0x8] sm:$0xff]  ;;  %v357_v17 = vld [vmem:[#allocation11 + $0x70] sm:$0xff] }
  0x3a   :  { %287 = vmatpush.msra.mxu1 %v242_v6  ;;  %v234_v15 = vld [vmem:[#allocation8 + $0x18] sm:$0xff]  ;;  %v355_v19 = vld [vmem:[#allocation11 + $0x60] sm:$0xff]  ;;  %376 = vmatpush.msra.mxu2 %v357_v17  ;;  %v356_v20 = vld [vmem:[#allocation11 + $0x68] sm:$0xff] }
  0x3b   :  { %268 = vmatpush.msra.mxu0 %v239_v5  ;;  %v358_v18 = vld [vmem:[#allocation11 + $0x78] sm:$0xff]  ;;  %v353_v34 = vld [vmem:[#allocation11 + $0x50] sm:$0xff]  ;;  %v351_v36 = vld [vmem:[#allocation11 + $0x40] sm:$0xff] }
  0x3c   :  { %288 = vmatpush.msra.mxu1 %v240_v8  ;;  %396 = vmatpush.msra.mxu3 %v358_v18  ;;  %v247_v22 = vld [vmem:[#allocation10] sm:$0x3]  ;;  %v352_v37 = vld [vmem:[#allocation11 + $0x48] sm:$0xff]  ;;  %v349_v38 = vld [vmem:[#allocation11 + $0x30] sm:$0xff] }
  0x3d   :  { %269 = vmatpush.msra.mxu0 %v237_v7  ;;  %377 = vmatpush.msra.mxu2 %v355_v19  ;;  %v249_v23 = vperm.slane %v247_v22, 0  ;;  %v250_v28 = vperm.slane %v247_v22, 1  ;;  %v354_v35 = vld [vmem:[#allocation11 + $0x58] sm:$0xff]  ;;  %v347_v40 = vld [vmem:[#allocation11 + $0x20] sm:$0xff]  ;;  %v348_v41 = vld [vmem:[#allocation11 + $0x28] sm:$0xff] }
  0x3e   :  { %289 = vmatpush.msra.mxu1 %v238_v10  ;;  %397 = vmatpush.msra.mxu3 %v356_v20  ;;  %v350_v39 = vld [vmem:[#allocation11 + $0x38] sm:$0xff]  ;;  %v345_v43 = vld [vmem:[#allocation11 + $0x10] sm:$0xff]  ;;  %v343_v45 = vld [vmem:[#allocation11] sm:$0xff] }
  0x3f   :  { %270 = vmatpush.msra.mxu0 %v235_v9  ;;  %378 = vmatpush.msra.mxu2 %v353_v34  ;;  %v346_v44 = vld [vmem:[#allocation11 + $0x18] sm:$0xff]  ;;  %v344_v46 = vld [vmem:[#allocation11 + $0x8] sm:$0xff]  ;;  %v359_v8 = vld [vmem:[%s1497_s4] sm:$0x3] }
  0x40   :  { %290 = vmatpush.msra.mxu1 %v236_v12  ;;  %398 = vmatpush.msra.mxu3 %v354_v35  ;;  %v361_v9 = vperm.slane %v359_v8, 0  ;;  %v498_v34 = vld [vmem:[#allocation16 + $0x38] sm:$0xff] }
  0x41   :  { %271 = vmatpush.msra.mxu0 %v233_v11  ;;  %379 = vmatpush.msra.mxu2 %v351_v36 }
  0x42   :  { %291 = vmatpush.msra.mxu1 %v234_v15  ;;  %399 = vmatpush.msra.mxu3 %v352_v37  ;;  %v528_v37 = vld [vmem:[#allocation17 + $0x30] sm:$0xff] }
  0x43   :  { %272 = vmatpush.msra.mxu0 %v231_v13  ;;  %380 = vmatpush.msra.mxu2 %v349_v38  ;;  %v497_v38 = vld [vmem:[#allocation16 + $0x30] sm:$0xff] }
  0x44   :  { %896 = vmatmul.msk.f32.vlgmr.msra.gmra.mxu0 %vm253_vm0, %v230_v14  ;;  %292 = vmatpush.msra.mxu1 %v232_v16 }
  0x45   :  { %897 = vmatmul.msk.f32.vlgmr.msra.gmra.mxu1 %vm253_vm0, %v230_v14  ;;  %400 = vmatpush.msra.mxu3 %v350_v39  ;;  %v362_v14 = vperm.slane %v359_v8, 1  ;;  %v527_v39 = vld [vmem:[#allocation17 + $0x28] sm:$0xff]  ;;  %v632_v8 = vld [vmem:[#allocation20 + $0x18] sm:$0xff] }
  0x46   :  { %381 = vmatpush.msra.mxu2 %v347_v40 }
  0x47   :  { %401 = vmatpush.msra.mxu3 %v348_v41 }
  0x48   :  { %382 = vmatpush.msra.mxu2 %v345_v43 }
  0x49   :  { %402 = vmatpush.msra.mxu3 %v346_v44  ;;  %v526_v44 = vld [vmem:[#allocation17 + $0x20] sm:$0xff] }
  0x4a   :  { %383 = vmatpush.msra.mxu2 %v343_v45  ;;  %v495_v45 = vld [vmem:[#allocation16 + $0x20] sm:$0xff] }
  0x4b   :  { %403 = vmatpush.msra.mxu3 %v344_v46 }
  0x4d   :  { %564 = vmatpush.msrb.mxu3 %v498_v34  ;;  %v703_v34 = vld [vmem:[#allocation22 + $0x70] sm:$0xff] }
  0x4f   :  { %565 = vmatpush.msrb.mxu3 %v497_v38  ;;  %v699_v38 = vld [vmem:[#allocation22 + $0x50] sm:$0xff] }
  0xc1   :  { %v274_v24 = vpop.f32.mrf.mxu0 }
  0xc2   :  { %v275_v25 = vadd.f32 %v274_v24, %v249_v23  ;;  %v294_v29 = vpop.f32.mrf.mxu1 }
  0xc3   :  { %v295_v30 = vadd.f32 %v294_v29, %v250_v28 }
  0xc4   :  { %939 = vtanh.f32 %v275_v25  ;;  %v898_v27 = vmul.f32 -1.442695, %v275_v25 }
  0xc5   :  { %v899_v31 = vmul.f32 -1.442695, %v295_v30 }
  0xc6   :  { %941 = vpow2.f32 %v898_v27 }
  0xc7   :  { %943 = vpow2.f32 %v899_v31 }
  0xca   :  { %v940_v26 = vpop.eup %939 }
  0xcb   :  { %337 = vrot.lane.b32.xlu0 %v940_v26, %s1308_s14 }
  0xcc   :  { %v942_v32 = vpop.eup %941 }
  0xcd   :  { %v300_v33 = vadd.f32 1.0, %v942_v32  ;;  %v944_v42 = vpop.eup %943 }
  0xce   :  { %v320_v47 = vadd.f32 1.0, %v944_v42  ;;  %v496_v42 = vld [vmem:[#allocation16 + $0x28] sm:$0xff] }
  0xcf   :  { %945 = vrcp.f32 %v300_v33  ;;  %v312_v55 = vand.u32 2147483648, %v300_v33  ;;  %vm306_vm2 = vweird.f32 %v300_v33  ;;  %v310_v57 = vand.u32 2147483647, %v300_v33  ;;  %566 = vmatpush.msrb.mxu3 %v496_v42  ;;  %v695_v42 = vld [vmem:[#allocation22 + $0x30] sm:$0xff] }
  0xd0   :  { %947 = vrcp.f32 %v320_v47  ;;  %vm326_vm6 = vweird.f32 %v320_v47  ;;  %v332_v0 = vand.u32 2147483648, %v320_v47  ;;  %v330_v2 = vand.u32 2147483647, %v320_v47 }
  0xd1   :  { %v313_v59 = vor.u32 1.1754944e-38, %v312_v55  ;;  %vm311_vm4 = vcmp.eq.f32.partialorder %v310_v57, 8.507059e+37  ;;  %567 = vmatpush.msrb.mxu3 %v495_v45  ;;  %v523_v55 = vld [vmem:[#allocation17 + $0x8] sm:$0xff] }
  0xd2   :  { %v333_v3 = vor.u32 1.1754944e-38, %v332_v0  ;;  %vm331_vm9 = vcmp.eq.f32.partialorder %v330_v2, 8.507059e+37  ;;  %v608_v0 = vld [vmem:[#allocation19 + $0x38] sm:$0xff]  ;;  %v635_v2 = vld [vmem:[#allocation20 + $0x30] sm:$0xff]  ;;  %v694_v45 = vld [vmem:[#allocation22 + $0x28] sm:$0xff] }
  0xd5   :  { %v946_v48 = vpop.eup %945 }
  0xd6   :  { %v302_v49 = vmul.f32 %v946_v48, %v300_v33  ;;  %v948_v51 = vpop.eup %947  ;;  %vm307_vm1 = vweird.f32 %v946_v48  ;;  %v529_v33 = vld [vmem:[#allocation17 + $0x38] sm:$0xff] }
  0xd7   :  { %v322_v53 = vmul.f32 %v948_v51, %v320_v47  ;;  %vm308_vm3 = vmor %vm306_vm2, %vm307_vm1  ;;  %vm327_vm7 = vweird.f32 %v948_v51  ;;  %541 = vmatpush.msrb.mxu2 %v529_v33  ;;  %v768_v33 = vld [vmem:[#allocation23 + $0x8] sm:$0xff] }
  0xd8   :  { %v303_v50 = vsub.f32 1.0, %v302_v49  ;;  %vm328_vm8 = vmor %vm326_vm6, %vm327_vm7  ;;  %v494_v49 = vld [vmem:[#allocation16 + $0x18] sm:$0xff] }
  0xd9   :  { %v323_v56 = vsub.f32 1.0, %v322_v53  ;;  %542 = vmatpush.msrb.mxu2 %v528_v37  ;;  %568 = vmatpush.msrb.mxu3 %v494_v49  ;;  %v702_v37 = vld [vmem:[#allocation22 + $0x68] sm:$0xff] }
  0xda   :  { %v304_v52 = vmul.f32 %v946_v48, %v303_v50  ;;  %v690_v49 = vld [vmem:[#allocation22 + $0x8] sm:$0xff] }
  0xdb   :  { %v324_v60 = vmul.f32 %v948_v51, %v323_v56  ;;  %543 = vmatpush.msrb.mxu2 %v527_v39  ;;  %v492_v56 = vld [vmem:[#allocation16 + $0x8] sm:$0xff]  ;;  %v700_v39 = vld [vmem:[#allocation22 + $0x58] sm:$0xff] }
  0xdc   :  { %v305_v54 = vadd.f32 %v946_v48, %v304_v52  ;;  %v493_v52 = vld [vmem:[#allocation16 + $0x10] sm:$0xff] }
  0xdd   :  { %v325_v1 = vadd.f32 %v948_v51, %v324_v60  ;;  %544 = vmatpush.msrb.mxu2 %v526_v44  ;;  %569 = vmatpush.msrb.mxu3 %v493_v52  ;;  %v463_v60 = vld [vmem:[#allocation13] sm:$0xff]  ;;  %v693_v44 = vld [vmem:[#allocation22 + $0x20] sm:$0xff] }
  0xde   :  { %v309_v58 = vsel %vm308_vm3, %v946_v48, %v305_v54  ;;  %v525_v48 = vld [vmem:[#allocation17 + $0x18] sm:$0xff]  ;;  %vm467_vm3 = vcmask 64512  }
  0xdf   :  { %v314_v62 = vsel %vm311_vm4, %v313_v59, %v309_v58  ;;  %v329_v4 = vsel %vm328_vm8, %v948_v51, %v325_v1  ;;  %v524_v51 = vld [vmem:[#allocation17 + $0x10] sm:$0xff]  ;;  %545 = vmatpush.msrb.mxu2 %v525_v48  ;;  %570 = vmatpush.msrb.mxu3 %v492_v56  ;;  %v689_v48 = vld [vmem:[#allocation22] sm:$0xff] }
  0xe0   :  { %v334_v6 = vsel %vm331_vm9, %v333_v3, %v329_v4  ;;  %v607_v3 = vld [vmem:[#allocation19 + $0x30] sm:$0xff]  ;;  %v634_v4 = vld [vmem:[#allocation20 + $0x28] sm:$0xff] }
  0xe1   :  { %546 = vmatpush.msrb.mxu2 %v524_v51 }
  0xe3   :  { %547 = vmatpush.msrb.mxu2 %v523_v55  ;;  %v937_v55 = vld [vmem:[%s1502_s9] ss:$0 sm:$0xff]  ;;  %s1309_s9 = smov [#allocation25]  }
  0xe4   :  { %s875_s29 = sshll.u32 %s1309_s9, 4  ;;  %s876_s29 = int_to_ptr.vmem [resolvable:$true] %s875_s29 }
 0x13d   :  { %v338_v61 = vpop.permute.xlu0 %337 }
 0x13e   :  { %v340_v63 = vmul.f32 %v338_v61, %v314_v62  ;;  %v464_v61 = vld [vmem:[#allocation14] sm:$0xff] }
 0x140   :  { %949 = vtanh.f32 %v340_v63  ;;  %460 = vst.msk [vmem:[#allocation3] sm:$0xf] %vm457_vm5, %v340_v63  ;;  %v636_v63 = vld [vmem:[#allocation20 + $0x38] sm:$0xff] }
 0x146   :  { %v950_v5 = vpop.eup %949 }
 0x147   :  { %v342_v7 = vmul.f32 %v950_v5, %v334_v6  ;;  %v606_v5 = vld [vmem:[#allocation19 + $0x28] sm:$0xff]  ;;  %v633_v6 = vld [vmem:[#allocation20 + $0x20] sm:$0xff] }
 0x149   :  { %900 = vmatmul.msk.f32.vlgmr.msra.gmra.mxu2 %vm253_vm0, %v342_v7  ;;  %458 = vst.msk [vmem:[#allocation2] sm:$0xf] %vm457_vm5, %v342_v7  ;;  %901 = vmatmul.msk.f32.vlgmr.msra.gmra.mxu3 %vm253_vm0, %v342_v7  ;;  %v605_v7 = vld [vmem:[#allocation19 + $0x20] sm:$0xff] }
 0x1cc   :  { %v385_v10 = vpop.f32.mrf.mxu2  ;;  %v405_v15 = vpop.f32.mrf.mxu3 }
 0x1cd   :  { %v386_v11 = vadd.f32 %v385_v10, %v361_v9  ;;  %v406_v16 = vadd.f32 %v405_v15, %v362_v14  ;;  %v604_v9 = vld [vmem:[#allocation19 + $0x18] sm:$0xff]  ;;  %v631_v10 = vld [vmem:[#allocation20 + $0x10] sm:$0xff]  ;;  %v522_v14 = vld [vmem:[#allocation17] sm:$0xff] }
 0x1ce   :  { %v491_v15 = vld [vmem:[#allocation16] sm:$0xff]  ;;  %548 = vmatpush.msrb.mxu2 %v522_v14 }
 0x1cf   :  { %951 = vtanh.f32 %v386_v11  ;;  %v902_v13 = vmul.f32 -1.442695, %v386_v11  ;;  %v903_v17 = vmul.f32 -1.442695, %v406_v16  ;;  %v603_v11 = vld [vmem:[#allocation19 + $0x10] sm:$0xff]  ;;  %571 = vmatpush.msrb.mxu3 %v491_v15  ;;  %v629_v16 = vld [vmem:[#allocation20] sm:$0xff] }
 0x1d0   :  { %716 = vmatpush.msra.mxu2 %v703_v34 }
 0x1d1   :  { %953 = vpow2.f32 %v902_v13  ;;  %v602_v13 = vld [vmem:[#allocation19 + $0x8] sm:$0xff] }
 0x1d2   :  { %955 = vpow2.f32 %v903_v17  ;;  %v601_v17 = vld [vmem:[#allocation19] sm:$0xff] }
 0x1d5   :  { %v952_v12 = vpop.eup %951 }
 0x1d6   :  { %448 = vrot.lane.b32.xlu0 %v952_v12, %s1308_s14  ;;  %v630_v12 = vld [vmem:[#allocation20 + $0x8] sm:$0xff] }
 0x1d7   :  { %v954_v18 = vpop.eup %953 }
 0x1d8   :  { %v411_v19 = vadd.f32 1.0, %v954_v18  ;;  %v956_v20 = vpop.eup %955  ;;  %v781_v18 = vld [vmem:[#allocation23 + $0x70] sm:$0xff] }
 0x1d9   :  { %v431_v21 = vadd.f32 1.0, %v956_v20  ;;  %v779_v20 = vld [vmem:[#allocation23 + $0x60] sm:$0xff] }
 0x1da   :  { %957 = vrcp.f32 %v411_v19  ;;  %v423_v30 = vand.u32 2147483648, %v411_v19  ;;  %vm417_vm11 = vweird.f32 %v411_v19  ;;  %v421_v31 = vand.u32 2147483647, %v411_v19 }
 0x1db   :  { %959 = vrcp.f32 %v431_v21  ;;  %v443_v47 = vand.u32 2147483648, %v431_v21  ;;  %vm437_vm15 = vweird.f32 %v431_v21  ;;  %v441_v50 = vand.u32 2147483647, %v431_v21 }
 0x1dc   :  { %v424_v36 = vor.u32 1.1754944e-38, %v423_v30  ;;  %vm422_vm13 = vcmp.eq.f32.partialorder %v421_v31, 8.507059e+37  ;;  %v769_v30 = vld [vmem:[#allocation23 + $0x10] sm:$0xff]  ;;  %v770_v31 = vld [vmem:[#allocation23 + $0x18] sm:$0xff] }
 0x1dd   :  { %v444_v54 = vor.u32 1.1754944e-38, %v443_v47  ;;  %vm442_vm2 = vcmp.eq.f32.partialorder %v441_v50, 8.507059e+37  ;;  %v692_v47 = vld [vmem:[#allocation22 + $0x18] sm:$0xff] }
 0x1e0   :  { %v958_v22 = vpop.eup %957 }
 0x1e1   :  { %v413_v23 = vmul.f32 %v958_v22, %v411_v19  ;;  %v960_v25 = vpop.eup %959  ;;  %vm418_vm10 = vweird.f32 %v958_v22  ;;  %v782_v19 = vld [vmem:[#allocation23 + $0x78] sm:$0xff] }
 0x1e2   :  { %v433_v27 = vmul.f32 %v960_v25, %v431_v21  ;;  %vm419_vm12 = vmor %vm417_vm11, %vm418_vm10  ;;  %vm438_vm14 = vweird.f32 %v960_v25  ;;  %v780_v21 = vld [vmem:[#allocation23 + $0x68] sm:$0xff] }
 0x1e3   :  { %v414_v24 = vsub.f32 1.0, %v413_v23  ;;  %vm439_vm1 = vmor %vm437_vm15, %vm438_vm14  ;;  %v778_v23 = vld [vmem:[#allocation23 + $0x58] sm:$0xff] }
 0x1e4   :  { %v434_v29 = vsub.f32 1.0, %v433_v27  ;;  %v774_v27 = vld [vmem:[#allocation23 + $0x38] sm:$0xff] }
 0x1e5   :  { %v415_v26 = vmul.f32 %v958_v22, %v414_v24  ;;  %v775_v24 = vld [vmem:[#allocation23 + $0x40] sm:$0xff] }
 0x1e6   :  { %v435_v35 = vmul.f32 %v960_v25, %v434_v29  ;;  %v772_v29 = vld [vmem:[#allocation23 + $0x28] sm:$0xff] }
 0x1e7   :  { %v416_v28 = vadd.f32 %v958_v22, %v415_v26  ;;  %v773_v26 = vld [vmem:[#allocation23 + $0x30] sm:$0xff] }
 0x1e8   :  { %v436_v46 = vadd.f32 %v960_v25, %v435_v35  ;;  %v704_v35 = vld [vmem:[#allocation22 + $0x78] sm:$0xff] }
 0x1e9   :  { %v420_v32 = vsel %vm419_vm12, %v958_v22, %v416_v28  ;;  %v777_v22 = vld [vmem:[#allocation23 + $0x50] sm:$0xff]  ;;  %v771_v28 = vld [vmem:[#allocation23 + $0x20] sm:$0xff]  ;;  %736 = vmatpush.msra.mxu3 %v704_v35 }
 0x1ea   :  { %v425_v41 = vsel %vm422_vm13, %v424_v36, %v420_v32  ;;  %v440_v53 = vsel %vm439_vm1, %v960_v25, %v436_v46  ;;  %v776_v25 = vld [vmem:[#allocation23 + $0x48] sm:$0xff]  ;;  %v767_v32 = vld [vmem:[#allocation23] sm:$0xff]  ;;  %v691_v46 = vld [vmem:[#allocation22 + $0x10] sm:$0xff] }
 0x1eb   :  { %v445_v58 = vsel %vm442_vm2, %v444_v54, %v440_v53  ;;  %v701_v36 = vld [vmem:[#allocation22 + $0x60] sm:$0xff]  ;;  %737 = vmatpush.msra.mxu3 %v702_v37 }
 0x1ec   :  { %717 = vmatpush.msra.mxu2 %v701_v36 }
 0x1ed   :  { %738 = vmatpush.msra.mxu3 %v700_v39 }
 0x1ee   :  { %718 = vmatpush.msra.mxu2 %v699_v38 }
 0x248   :  { %v449_v40 = vpop.permute.xlu0 %448 }
 0x249   :  { %v451_v43 = vmul.f32 %v449_v40, %v425_v41  ;;  %v697_v40 = vld [vmem:[#allocation22 + $0x40] sm:$0xff]  ;;  %v698_v41 = vld [vmem:[#allocation22 + $0x48] sm:$0xff] }
 0x24a   :  { %719 = vmatpush.msra.mxu2 %v697_v40  ;;  %739 = vmatpush.msra.mxu3 %v698_v41 }
 0x24b   :  { %961 = vtanh.f32 %v451_v43  ;;  %461 = vst.msk [vmem:[#allocation3 + $0x4] sm:$0xf] %vm457_vm5, %v451_v43  ;;  %v696_v43 = vld [vmem:[#allocation22 + $0x38] sm:$0xff] }
 0x24c   :  { %720 = vmatpush.msra.mxu2 %v695_v42  ;;  %740 = vmatpush.msra.mxu3 %v696_v43 }
 0x24e   :  { %721 = vmatpush.msra.mxu2 %v693_v44  ;;  %741 = vmatpush.msra.mxu3 %v694_v45 }
 0x250   :  { %722 = vmatpush.msra.mxu2 %v691_v46  ;;  %742 = vmatpush.msra.mxu3 %v692_v47 }
 0x251   :  { %v962_v57 = vpop.eup %961 }
 0x252   :  { %v453_v59 = vmul.f32 %v962_v57, %v445_v58  ;;  %v466_v1 = vld [vmem:[#allocation3] sm:$0xff]  ;;  %723 = vmatpush.msra.mxu2 %v689_v48  ;;  %743 = vmatpush.msra.mxu3 %v690_v49 }
 0x254   :  { %459 = vst.msk [vmem:[#allocation2 + $0x4] sm:$0xf] %vm457_vm5, %v453_v59 }
 0x255   :  { %462 = vst.msk [vmem:[#allocation4] sm:$0xf] %vm457_vm5, %v453_v59 }
 0x25b   :  { %v465_v62 = vld [vmem:[#allocation2] sm:$0xff] }
 0x25c   :  { %486 = vmatpush.msrb.mxu0 %v465_v62  ;;  %517 = vmatpush.msrb.mxu1 %v465_v62  ;;  %v766_v54 = vld [vmem:[#allocation4] sm:$0xff] }
 0x25d   :  { %904 = vmatmul.msk.f32.vlgmr.msrb.gmra.mxu0 %vm467_vm3, %v463_v60  ;;  %905 = vmatmul.msk.f32.vlgmr.msrb.gmra.mxu1 %vm467_vm3, %v464_v61 }
 0x25e   :  { %596 = vmatpush.msra.mxu0 %v466_v1  ;;  %624 = vmatpush.msra.mxu1 %v466_v1 }
 0x260   :  { %648 = vmatpush.msrb.mxu0 %v636_v63  ;;  %671 = vmatpush.msrb.mxu1 %v608_v0  ;;  %v938_v0 = vld [vmem:[%s1505_s12] ss:$0 sm:$0xff]  ;;  %s877_s12 = sshll.u32 %s1508_s15, 4  ;;  %s878_s12 = int_to_ptr.hbm [resolvable:$true] %s877_s12 }
 0x262   :  { %649 = vmatpush.msrb.mxu0 %v635_v2  ;;  %672 = vmatpush.msrb.mxu1 %v607_v3 }
 0x264   :  { %650 = vmatpush.msrb.mxu0 %v634_v4  ;;  %673 = vmatpush.msrb.mxu1 %v606_v5 }
 0x265   :  { %908 = vmatmul.msk.f32.vlgmr.msra.gmra.mxu0 %vm467_vm3, %v463_v60  ;;  %909 = vmatmul.msk.f32.vlgmr.msra.gmra.mxu1 %vm467_vm3, %v464_v61 }
 0x266   :  { %651 = vmatpush.msrb.mxu0 %v633_v6  ;;  %674 = vmatpush.msrb.mxu1 %v605_v7 }
 0x268   :  { %652 = vmatpush.msrb.mxu0 %v632_v8  ;;  %675 = vmatpush.msrb.mxu1 %v604_v9 }
 0x26a   :  { %653 = vmatpush.msrb.mxu0 %v631_v10  ;;  %676 = vmatpush.msrb.mxu1 %v603_v11 }
 0x26c   :  { %654 = vmatpush.msrb.mxu0 %v630_v12  ;;  %677 = vmatpush.msrb.mxu1 %v602_v13 }
 0x26e   :  { %655 = vmatpush.msrb.mxu0 %v629_v16  ;;  %678 = vmatpush.msrb.mxu1 %v601_v17 }
 0x270   :  { %794 = vmatpush.msra.mxu0 %v781_v18  ;;  %814 = vmatpush.msra.mxu1 %v782_v19 }
 0x272   :  { %795 = vmatpush.msra.mxu0 %v779_v20  ;;  %815 = vmatpush.msra.mxu1 %v780_v21 }
 0x274   :  { %796 = vmatpush.msra.mxu0 %v777_v22  ;;  %816 = vmatpush.msra.mxu1 %v778_v23 }
 0x276   :  { %797 = vmatpush.msra.mxu0 %v775_v24  ;;  %817 = vmatpush.msra.mxu1 %v776_v25 }
 0x278   :  { %798 = vmatpush.msra.mxu0 %v773_v26  ;;  %818 = vmatpush.msra.mxu1 %v774_v27 }
 0x27a   :  { %799 = vmatpush.msra.mxu0 %v771_v28  ;;  %819 = vmatpush.msra.mxu1 %v772_v29 }
 0x27c   :  { %800 = vmatpush.msra.mxu0 %v769_v30  ;;  %820 = vmatpush.msra.mxu1 %v770_v31 }
 0x27e   :  { %801 = vmatpush.msra.mxu0 %v767_v32  ;;  %821 = vmatpush.msra.mxu1 %v768_v33 }
 0x2da   :  { %v488_v50 = vpop.f32.mrf.mxu0  ;;  %v519_v51 = vpop.f32.mrf.mxu1 }
 0x2db   :  { %906 = vmatmul.msk.f32.vlgmr.msrb.gmra.mxu2 %vm253_vm0, %v519_v51  ;;  %907 = vmatmul.msk.f32.vlgmr.msrb.gmra.mxu3 %vm253_vm0, %v488_v50 }
 0x2dc   :  { %837 = vmatpush.msrb.mxu2 %v703_v34  ;;  %857 = vmatpush.msrb.mxu3 %v704_v35 }
 0x2de   :  { %838 = vmatpush.msrb.mxu2 %v701_v36  ;;  %858 = vmatpush.msrb.mxu3 %v702_v37 }
 0x2e0   :  { %839 = vmatpush.msrb.mxu2 %v699_v38  ;;  %859 = vmatpush.msrb.mxu3 %v700_v39 }
 0x2e2   :  { %v598_v52 = vpop.f32.mrf.mxu0  ;;  %v626_v53 = vpop.f32.mrf.mxu1  ;;  %840 = vmatpush.msrb.mxu2 %v697_v40  ;;  %860 = vmatpush.msrb.mxu3 %v698_v41 }
 0x2e3   :  { %910 = vmatmul.msk.f32.vlgmr.msrb.gmra.mxu0 %vm253_vm0, %v626_v53  ;;  %911 = vmatmul.msk.f32.vlgmr.msrb.gmra.mxu1 %vm253_vm0, %v598_v52 }
 0x2e4   :  { %841 = vmatpush.msrb.mxu2 %v695_v42  ;;  %861 = vmatpush.msrb.mxu3 %v696_v43 }
 0x2e6   :  { %842 = vmatpush.msrb.mxu2 %v693_v44  ;;  %862 = vmatpush.msrb.mxu3 %v694_v45 }
 0x2e8   :  { %843 = vmatpush.msrb.mxu2 %v691_v46  ;;  %863 = vmatpush.msrb.mxu3 %v692_v47 }
 0x2ea   :  { %844 = vmatpush.msrb.mxu2 %v689_v48  ;;  %864 = vmatpush.msrb.mxu3 %v690_v49 }
 0x2eb   :  { %914 = vmatmul.msk.f32.vlgmr.msra.gmra.mxu0 %vm253_vm0, %v766_v54  ;;  %915 = vmatmul.msk.f32.vlgmr.msra.gmra.mxu1 %vm253_vm0, %v766_v54 }
 0x35e   :  { %v550_v56 = vpop.f32.mrf.mxu2  ;;  %v573_v57 = vpop.f32.mrf.mxu3 }
 0x35f   :  { %v574_v58 = vadd.f32 %v573_v57, %v550_v56 }
 0x360   :  { %v657_v61 = vpop.f32.mrf.mxu0  ;;  %v680_v62 = vpop.f32.mrf.mxu1 }
 0x361   :  { %v580_v59 = vadd.f32 %v937_v55, %v574_v58  ;;  %v681_v63 = vadd.f32 %v680_v62, %v657_v61 }
 0x363   :  { %v688_v60 = vmul.f32 0.05, %v580_v59  ;;  %v687_v1 = vadd.f32 %v938_v0, %v681_v63 }
 0x365   :  { %912 = vmatmul.msk.f32.vlgmr.msra.gmra.mxu2 %vm253_vm0, %v688_v60  ;;  %913 = vmatmul.msk.f32.vlgmr.msra.gmra.mxu3 %vm253_vm0, %v688_v60 }
 0x368   :  { %v803_v4 = vpop.f32.mrf.mxu0  ;;  %v823_v5 = vpop.f32.mrf.mxu1 }
 0x36d   :  { %916 = vmatmul.msk.f32.vlgmr.msrb.gmra.mxu2 %vm253_vm0, %v687_v1  ;;  %917 = vmatmul.msk.f32.vlgmr.msrb.gmra.mxu3 %vm253_vm0, %v687_v1 }
 0x3e8   :  { %v725_v2 = vpop.f32.mrf.mxu2  ;;  %v745_v3 = vpop.f32.mrf.mxu3 }
 0x3e9   :  { %748 = vst [vmem:[#allocation25] sm:$0xff] %v725_v2 }
 0x3ea   :  { %749 = vst [vmem:[#allocation25 + $0x8] sm:$0xff] %v745_v3 }
 0x3f0   :  { %v846_v6 = vpop.f32.mrf.mxu2  ;;  %v866_v7 = vpop.f32.mrf.mxu3 }
 0x3f1   :  { %v847_v8 = vadd.f32 %v846_v6, %v803_v4  ;;  %v867_v9 = vadd.f32 %v866_v7, %v823_v5 }
 0x3f3   :  { %869 = vst [vmem:[#allocation25 + $0x10] sm:$0xff] %v847_v8 }
 0x3f4   :  { %870 = vst [vmem:[#allocation25 + $0x18] sm:$0xff] %v867_v9 }
 0x3f5   :  { %883 = dma.vmem_to_hbm [thread:$0]  %s876_s29, 512, %s878_s12, [#allocation7], %s1292_s26, %s1292_s26, %s1293_s27  }
 0x3f6   :  { %1289 = dma.done.wait [#allocation7], 512  }
 0x3f7   :  { %1290 = vsyncadd [#allocation7], 4294966784 }
 0x3f8   :  { %888 = vsyncpa [#allocation6], 1 }
 0x3f9   :  { %889 = vsyncpa [#allocation9], 1 }
 0x3fa   :  { %890 = vsyncpa [#allocation12], 1 }
 0x3fb   :  { %891 = vsyncpa [#allocation15], 1 }
 0x3fc   :  { %892 = vsyncpa [#allocation18], 1 }
 0x3fd   :  { %893 = vsyncpa [#allocation21], 1 }
 0x3fe   :  { %894 = vsyncpa [#allocation24], 1 }
 0x3ff   :  { %895 = vsyncpa [#allocation7], 1 }

</bundles_post_ra>
